<compile_context>
chip_gen: v5e
topology: v5e:2x2
jax: 0.10.0
libtpu: 0.0.40
codegen_flags: <defaults>
</compile_context>

<pallas_src>
import numpy as np
import jax
import jax.numpy as jnp
from jax.experimental import pallas as pl
from jax.experimental.pallas import tpu as pltpu


# ----------------------------------------------------------------------------
# Pallas kernel: full 3-layer IGNNK model, all batches of the block at once.
# ----------------------------------------------------------------------------
def ignnk_kernel(x_ref, mask_ref, aqt_ref, aht_ref, aqbd_ref, ahbd_ref,
                 w1_ref, b1_ref, w2_ref, b2_ref, w3_ref, b3_ref, out_ref):
    # x_ref / mask_ref / out_ref blocks: (bb*S, N), time-major, batch-stacked rows.
    N = aqt_ref.shape[0]
    S = w1_ref.shape[0] // 3
    bb = x_ref.shape[0] // S

    # x[mask == 0] = 0
    xm = jnp.where(mask_ref[...] == 0.0, 0.0, x_ref[...])                   # (bb*S, N)

    # ---- layer 1: h -> z (relu) -------------------------------------------
    # Time-major diffusion, batch folded over rows: (A_q X_b)^T = X_b^T A_q^T.
    qt = jnp.dot(xm, aqt_ref[...], preferred_element_type=jnp.float32)      # (bb*S, N)
    ht = jnp.dot(xm, aht_ref[...], preferred_element_type=jnp.float32)      # (bb*S, N)

    # Node-major fused LHS [X_b | A_q X_b | A_h X_b], stacked over batch.
    rows = []
    for b in range(bb):
        sl = slice(b * S, (b + 1) * S)
        stk = jnp.concatenate([xm[sl], qt[sl], ht[sl]], axis=0)             # (3S, N)
        rows.append(stk.T)                                                  # (N, 3S)
    c1 = jnp.concatenate(rows, axis=0)                                      # (bb*N, 3S)

    xs1 = jnp.maximum(
        jnp.dot(c1, w1_ref[...], preferred_element_type=jnp.float32)
        + b1_ref[...], 0.0)                                                 # (bb*N, Zp)

    # ---- layers 2 & 3: node-major, block-diagonal adjacency ----------------
    aq_bd = aqbd_ref[...]
    ah_bd = ahbd_ref[...]

    def fused_dgcn(h, w, bias):
        hq = jnp.dot(aq_bd, h, preferred_element_type=jnp.float32)
        hh = jnp.dot(ah_bd, h, preferred_element_type=jnp.float32)
        c = jnp.concatenate([h, hq, hh], axis=1)                            # (bb*N, 3F)
        return jnp.dot(c, w, preferred_element_type=jnp.float32) + bias

    xs2 = jnp.maximum(fused_dgcn(xs1, w2_ref[...], b2_ref[...]), 0.0) + xs1  # (bb*N, Zp)
    xs3 = fused_dgcn(xs2, w3_ref[...], b3_ref[...])                          # (bb*N, S)

    # Back to the public time-major layout (bb*S, N)  (== X_s3.permute(0,2,1)).
    outs = [xs3[b * N:(b + 1) * N, :].T for b in range(bb)]                  # (S, N) each
    out_ref[...] = jnp.concatenate(outs, axis=0)                             # (bb*S, N)


# ----------------------------------------------------------------------------
# Host-side helpers (parameter setup, random-walk matrix, weight packing).
# ----------------------------------------------------------------------------
def calculate_random_walk_matrix(adj):
    d = adj.sum(axis=1)
    d_inv = np.where(d > 0, 1.0 / np.where(d > 0, d, 1.0), 0.0)
    return (np.diag(d_inv) @ adj).astype(np.float32)


def make_dgcn_params(key, in_channels, out_channels, num_matrices=3):
    # Matches D_GCN.__init__: Theta1 (F*num_matrices, O) interleaved rows, bias (1, O).
    k1, k2 = jax.random.split(key)
    stdv = 1.0 / np.sqrt(out_channels)
    theta = jax.random.uniform(k1, (in_channels * num_matrices, out_channels),
                               jnp.float32, -stdv, stdv)
    bias = jax.random.uniform(k2, (1, out_channels), jnp.float32, -stdv, stdv)
    return theta, bias


def pack_dgcn_weights(theta, bias, f_in, f_out, f_in_pad, f_out_pad):
    """Reorder interleaved Theta1 (row index = f*3 + m) into blocked [T0; T1; T2]
    and zero-pad features to (3*f_in_pad, f_out_pad).  One-time host-side prep."""
    t = theta.reshape(f_in, 3, f_out)
    blocks = [jnp.pad(t[:, m, :], ((0, f_in_pad - f_in), (0, f_out_pad - f_out)))
              for m in range(3)]
    w = jnp.concatenate(blocks, axis=0)
    b = jnp.pad(bias, ((0, 0), (0, f_out_pad - f_out)))
    return w, b


def _block_diag(a, reps):
    if reps == 1:
        return a
    n = a.shape[0]
    out = jnp.zeros((reps * n, reps * n), a.dtype)
    for i in range(reps):
        out = out.at[i * n:(i + 1) * n, i * n:(i + 1) * n].set(a)
    return out


def ignnk_forward(x, mask, A_q, A_h, packed, batch_block=None):
    """x, mask: (B, S, N).  Returns imputation of shape (B, S, N)."""
    B, S, N = x.shape
    Zp = packed["w1"].shape[-1]

    # All batches in one grid step by default (overhead-bound at small B).
    # On v7x with larger B, use batch_block = B // 2 for a 2-way parallel grid.
    bb = B if batch_block is None else batch_block
    assert B % bb == 0
    nb = B // bb

    # Free layout collapses (no transposes, no extra HBM round trips).
    x2 = x.reshape(B * S, N)
    m2 = mask.reshape(B * S, N)

    aqt = jnp.transpose(A_q)
    aht = jnp.transpose(A_h)
    aq_bd = _block_diag(A_q, bb)
    ah_bd = _block_diag(A_h, bb)

    blk = pl.BlockSpec((bb * S, N), lambda g: (g, 0))
    full = lambda r, c: pl.BlockSpec((r, c), lambda g: (0, 0))

    out = pl.pallas_call(
        ignnk_kernel,
        out_shape=jax.ShapeDtypeStruct((B * S, N), jnp.float32),
        grid_spec=pltpu.PrefetchScalarGridSpec(
            num_scalar_prefetch=0,
            grid=(nb,),
            in_specs=[
                blk, blk,                                      # x, mask
                full(N, N), full(N, N),                        # A_q^T, A_h^T
                full(bb * N, bb * N), full(bb * N, bb * N),    # block-diag A_q, A_h
                full(3 * S, Zp), full(1, Zp),                  # layer 1 (fused, Z padded)
                full(3 * Zp, Zp), full(1, Zp),                 # layer 2
                full(3 * Zp, S), full(1, S),                   # layer 3
            ],
            out_specs=blk,
        ),
        compiler_params=pltpu.CompilerParams(
            dimension_semantics=("parallel",)),
    )(x2, m2, aqt, aht, aq_bd, ah_bd,
      packed["w1"], packed["b1"], packed["w2"], packed["b2"],
      packed["w3"], packed["b3"])

    return out.reshape(B, S, N)


def ignnk_reference(x, mask, A_q, A_h, raw):
    """Pure-JAX reference matching the PyTorch module semantics (raw weights)."""
    xm = jnp.where(mask == 0, 0.0, x)                 # (B, S, N)
    X = jnp.transpose(xm, (0, 2, 1))                  # (B, N, S)

    def d_gcn(X, theta, bias, relu):
        f = X.shape[-1]
        sup = [X,
               jnp.einsum("ij,bjf->bif", A_q, X, precision="highest"),
               jnp.einsum("ij,bjf->bif", A_h, X, precision="highest")]
        cat = jnp.stack(sup, axis=-1).reshape(X.shape[0], X.shape[1], f * 3)  # (f, m) interleave
        out = jnp.einsum("bnk,ko->bno", cat, theta, precision="highest") + bias
        return jnp.maximum(out, 0.0) if relu else out

    xs1 = d_gcn(X, raw["theta1"], raw["bias1"], True)
    xs2 = d_gcn(xs1, raw["theta2"], raw["bias2"], True) + xs1
    xs3 = d_gcn(xs2, raw["theta3"], raw["bias3"], False)
    return jnp.transpose(xs3, (0, 2, 1))


if __name__ == "__main__":
    B, S, N, Z, Zp = 2, 24, 16, 100, 128   # batch, window h=24, nodes, z=100 (fixed), lane-padded z

    key = jax.random.PRNGKey(0)
    k_adj, k_x, k_m, k_p1, k_p2, k_p3 = jax.random.split(key, 6)

    # Deterministic synthetic adjacency (non-negative, positive row sums).
    adj_np = np.asarray(jax.random.uniform(k_adj, (N, N), jnp.float32))
    adj_np = (adj_np + adj_np.T) / 2.0
    np.fill_diagonal(adj_np, 1.0)

    # Both buffers built exactly as in the module: random_walk(adj).T
    A_q = jnp.asarray(calculate_random_walk_matrix(adj_np).T)
    A_h = jnp.asarray(calculate_random_walk_matrix(adj_np).T)

    # Inputs: x (B, S, N), binary mask (B, S, N)
    x = jax.random.normal(k_x, (B, S, N), jnp.float32)
    mask = (jax.random.uniform(k_m, (B, S, N)) > 0.25).astype(jnp.float32)

    # Raw parameters (shapes from D_GCN.__init__ with orders=1 -> 3 matrices)
    theta1, bias1 = make_dgcn_params(k_p1, S, Z)   # GNN1: h -> z, relu
    theta2, bias2 = make_dgcn_params(k_p2, Z, Z)   # GNN2: z -> z, relu (+residual)
    theta3, bias3 = make_dgcn_params(k_p3, Z, S)   # GNN3: z -> h, linear

    # One-time packing: blocked [T0;T1;T2] with hidden dim zero-padded to 128.
    w1, b1 = pack_dgcn_weights(theta1, bias1, S, Z, S, Zp)
    w2, b2 = pack_dgcn_weights(theta2, bias2, Z, Z, Zp, Zp)
    w3, b3 = pack_dgcn_weights(theta3, bias3, Z, S, Zp, S)
    packed = {"w1": w1, "b1": b1, "w2": w2, "b2": b2, "w3": w3, "b3": b3}
    raw = {"theta1": theta1, "bias1": bias1, "theta2": theta2, "bias2": bias2,
           "theta3": theta3, "bias3": bias3}

    imputation = jax.block_until_ready(ignnk_forward(x, mask, A_q, A_h, packed))
    ref = jax.block_until_ready(ignnk_reference(x, mask, A_q, A_h, raw))

    assert imputation.shape == (B, S, N)
    np.testing.assert_allclose(np.asarray(imputation), np.asarray(ref),
                               rtol=1e-2, atol=1e-2)

    print("KERNEL_OK")
</pallas_src>

<mosaic_0001>
module attributes {stable_mosaic.version = 11 : i64} {
  func.func @ignnk_kernel(%arg0: i32, %arg1: memref<48x16xf32, #tpu.memory_space<vmem>>, %arg2: memref<48x16xf32, #tpu.memory_space<vmem>>, %arg3: memref<16x16xf32, #tpu.memory_space<vmem>>, %arg4: memref<16x16xf32, #tpu.memory_space<vmem>>, %arg5: memref<32x32xf32, #tpu.memory_space<vmem>>, %arg6: memref<32x32xf32, #tpu.memory_space<vmem>>, %arg7: memref<72x128xf32, #tpu.memory_space<vmem>>, %arg8: memref<1x128xf32, #tpu.memory_space<vmem>>, %arg9: memref<384x128xf32, #tpu.memory_space<vmem>>, %arg10: memref<1x128xf32, #tpu.memory_space<vmem>>, %arg11: memref<384x24xf32, #tpu.memory_space<vmem>>, %arg12: memref<1x24xf32, #tpu.memory_space<vmem>>, %arg13: memref<48x16xf32, #tpu.memory_space<vmem>>) attributes {dimension_semantics = [#tpu.dimension_semantics<parallel>], iteration_bounds = array<i64: 1>, scalar_prefetch = 0 : i64, scratch_operands = 0 : i64, tpu.core_type = #tpu.core_type<tc>, window_params = [{transform_indices = @transform_0, window_bounds = array<i64: 48, 16>}, {transform_indices = @transform_1, window_bounds = array<i64: 48, 16>}, {pipeline_mode = #tpu.pipeline_mode<synchronous>, transform_indices = @transform_2, window_bounds = array<i64: 16, 16>}, {pipeline_mode = #tpu.pipeline_mode<synchronous>, transform_indices = @transform_3, window_bounds = array<i64: 16, 16>}, {pipeline_mode = #tpu.pipeline_mode<synchronous>, transform_indices = @transform_4, window_bounds = array<i64: 32, 32>}, {pipeline_mode = #tpu.pipeline_mode<synchronous>, transform_indices = @transform_5, window_bounds = array<i64: 32, 32>}, {pipeline_mode = #tpu.pipeline_mode<synchronous>, transform_indices = @transform_6, window_bounds = array<i64: 72, 128>}, {pipeline_mode = #tpu.pipeline_mode<synchronous>, transform_indices = @transform_7, window_bounds = array<i64: 1, 128>}, {pipeline_mode = #tpu.pipeline_mode<synchronous>, transform_indices = @transform_8, window_bounds = array<i64: 384, 128>}, {pipeline_mode = #tpu.pipeline_mode<synchronous>, transform_indices = @transform_9, window_bounds = array<i64: 1, 128>}, {pipeline_mode = #tpu.pipeline_mode<synchronous>, transform_indices = @transform_10, window_bounds = array<i64: 384, 24>}, {pipeline_mode = #tpu.pipeline_mode<synchronous>, transform_indices = @transform_11, window_bounds = array<i64: 1, 24>}, {transform_indices = @transform_12, window_bounds = array<i64: 48, 16>}]} {
    %c0 = arith.constant 0 : index
    %c0_0 = arith.constant 0 : index
    %0 = vector.load %arg2[%c0, %c0_0] : memref<48x16xf32, #tpu.memory_space<vmem>>, vector<48x16xf32>
    %cst = arith.constant 0.000000e+00 : f32
    %1 = vector.broadcast %cst : f32 to vector<48x16xf32>
    %2 = arith.cmpf oeq, %0, %1 : vector<48x16xf32>
    %c0_1 = arith.constant 0 : index
    %c0_2 = arith.constant 0 : index
    %3 = vector.load %arg1[%c0_1, %c0_2] : memref<48x16xf32, #tpu.memory_space<vmem>>, vector<48x16xf32>
    %cst_3 = arith.constant 0.000000e+00 : f32
    %4 = vector.broadcast %cst_3 : f32 to vector<48x16xf32>
    %5 = arith.select %2, %4, %3 : vector<48x16xi1>, vector<48x16xf32>
    %c0_4 = arith.constant 0 : index
    %c0_5 = arith.constant 0 : index
    %6 = vector.load %arg3[%c0_4, %c0_5] : memref<16x16xf32, #tpu.memory_space<vmem>>, vector<16x16xf32>
    %cst_6 = arith.constant dense<0.000000e+00> : vector<48x16xf32>
    %7 = tpu.matmul %5, %6, %cst_6 {dimension_numbers = #tpu.dot_dimension_numbers<[1], [0], [0], [1], [0, 0, 1, 1], [], []>} : vector<48x16xf32>, vector<16x16xf32>, vector<48x16xf32> -> vector<48x16xf32>
    %c0_7 = arith.constant 0 : index
    %c0_8 = arith.constant 0 : index
    %8 = vector.load %arg4[%c0_7, %c0_8] : memref<16x16xf32, #tpu.memory_space<vmem>>, vector<16x16xf32>
    %cst_9 = arith.constant dense<0.000000e+00> : vector<48x16xf32>
    %9 = tpu.matmul %5, %8, %cst_9 {dimension_numbers = #tpu.dot_dimension_numbers<[1], [0], [0], [1], [0, 0, 1, 1], [], []>} : vector<48x16xf32>, vector<16x16xf32>, vector<48x16xf32> -> vector<48x16xf32>
    %10 = vector.extract_strided_slice %5 {offsets = [0, 0], sizes = [24, 16], strides = [1, 1]} : vector<48x16xf32> to vector<24x16xf32>
    %11 = vector.extract_strided_slice %7 {offsets = [0, 0], sizes = [24, 16], strides = [1, 1]} : vector<48x16xf32> to vector<24x16xf32>
    %12 = vector.extract_strided_slice %9 {offsets = [0, 0], sizes = [24, 16], strides = [1, 1]} : vector<48x16xf32> to vector<24x16xf32>
    %13 = tpu.concatenate %10, %11, %12 in 0 : vector<24x16xf32>, vector<24x16xf32>, vector<24x16xf32> -> vector<72x16xf32>
    %14 = tpu.transpose %13, [1, 0] : vector<72x16xf32> -> vector<16x72xf32>
    %15 = vector.extract_strided_slice %5 {offsets = [24, 0], sizes = [24, 16], strides = [1, 1]} : vector<48x16xf32> to vector<24x16xf32>
    %16 = vector.extract_strided_slice %7 {offsets = [24, 0], sizes = [24, 16], strides = [1, 1]} : vector<48x16xf32> to vector<24x16xf32>
    %17 = vector.extract_strided_slice %9 {offsets = [24, 0], sizes = [24, 16], strides = [1, 1]} : vector<48x16xf32> to vector<24x16xf32>
    %18 = tpu.concatenate %15, %16, %17 in 0 : vector<24x16xf32>, vector<24x16xf32>, vector<24x16xf32> -> vector<72x16xf32>
    %19 = tpu.transpose %18, [1, 0] : vector<72x16xf32> -> vector<16x72xf32>
    %20 = tpu.concatenate %14, %19 in 0 : vector<16x72xf32>, vector<16x72xf32> -> vector<32x72xf32>
    %c0_10 = arith.constant 0 : index
    %c0_11 = arith.constant 0 : index
    %21 = vector.load %arg7[%c0_10, %c0_11] : memref<72x128xf32, #tpu.memory_space<vmem>>, vector<72x128xf32>
    %cst_12 = arith.constant dense<0.000000e+00> : vector<32x128xf32>
    %22 = tpu.matmul %20, %21, %cst_12 {dimension_numbers = #tpu.dot_dimension_numbers<[1], [0], [0], [1], [0, 0, 1, 1], [], []>} : vector<32x72xf32>, vector<72x128xf32>, vector<32x128xf32> -> vector<32x128xf32>
    %c0_13 = arith.constant 0 : index
    %c0_14 = arith.constant 0 : index
    %23 = vector.load %arg8[%c0_13, %c0_14] : memref<1x128xf32, #tpu.memory_space<vmem>>, vector<1x128xf32>
    %24 = vector.broadcast %23 : vector<1x128xf32> to vector<32x128xf32>
    %25 = arith.addf %22, %24 : vector<32x128xf32>
    %cst_15 = arith.constant 0.000000e+00 : f32
    %26 = vector.broadcast %cst_15 : f32 to vector<32x128xf32>
    %27 = arith.maximumf %25, %26 : vector<32x128xf32>
    %c0_16 = arith.constant 0 : index
    %c0_17 = arith.constant 0 : index
    %28 = vector.load %arg5[%c0_16, %c0_17] : memref<32x32xf32, #tpu.memory_space<vmem>>, vector<32x32xf32>
    %c0_18 = arith.constant 0 : index
    %c0_19 = arith.constant 0 : index
    %29 = vector.load %arg6[%c0_18, %c0_19] : memref<32x32xf32, #tpu.memory_space<vmem>>, vector<32x32xf32>
    %c0_20 = arith.constant 0 : index
    %c0_21 = arith.constant 0 : index
    %30 = vector.load %arg9[%c0_20, %c0_21] : memref<384x128xf32, #tpu.memory_space<vmem>>, vector<384x128xf32>
    %c0_22 = arith.constant 0 : index
    %c0_23 = arith.constant 0 : index
    %31 = vector.load %arg10[%c0_22, %c0_23] : memref<1x128xf32, #tpu.memory_space<vmem>>, vector<1x128xf32>
    %cst_24 = arith.constant dense<0.000000e+00> : vector<32x128xf32>
    %32 = tpu.matmul %28, %27, %cst_24 {dimension_numbers = #tpu.dot_dimension_numbers<[1], [0], [0], [1], [0, 0, 1, 1], [], []>} : vector<32x32xf32>, vector<32x128xf32>, vector<32x128xf32> -> vector<32x128xf32>
    %cst_25 = arith.constant dense<0.000000e+00> : vector<32x128xf32>
    %33 = tpu.matmul %29, %27, %cst_25 {dimension_numbers = #tpu.dot_dimension_numbers<[1], [0], [0], [1], [0, 0, 1, 1], [], []>} : vector<32x32xf32>, vector<32x128xf32>, vector<32x128xf32> -> vector<32x128xf32>
    %34 = tpu.concatenate %27, %32, %33 in 1 : vector<32x128xf32>, vector<32x128xf32>, vector<32x128xf32> -> vector<32x384xf32>
    %cst_26 = arith.constant dense<0.000000e+00> : vector<32x128xf32>
    %35 = tpu.matmul %34, %30, %cst_26 {dimension_numbers = #tpu.dot_dimension_numbers<[1], [0], [0], [1], [0, 0, 1, 1], [], []>} : vector<32x384xf32>, vector<384x128xf32>, vector<32x128xf32> -> vector<32x128xf32>
    %36 = vector.broadcast %31 : vector<1x128xf32> to vector<32x128xf32>
    %37 = arith.addf %35, %36 : vector<32x128xf32>
    %cst_27 = arith.constant 0.000000e+00 : f32
    %38 = vector.broadcast %cst_27 : f32 to vector<32x128xf32>
    %39 = arith.maximumf %37, %38 : vector<32x128xf32>
    %40 = arith.addf %39, %27 : vector<32x128xf32>
    %c0_28 = arith.constant 0 : index
    %c0_29 = arith.constant 0 : index
    %41 = vector.load %arg11[%c0_28, %c0_29] : memref<384x24xf32, #tpu.memory_space<vmem>>, vector<384x24xf32>
    %c0_30 = arith.constant 0 : index
    %c0_31 = arith.constant 0 : index
    %42 = vector.load %arg12[%c0_30, %c0_31] : memref<1x24xf32, #tpu.memory_space<vmem>>, vector<1x24xf32>
    %cst_32 = arith.constant dense<0.000000e+00> : vector<32x128xf32>
    %43 = tpu.matmul %28, %40, %cst_32 {dimension_numbers = #tpu.dot_dimension_numbers<[1], [0], [0], [1], [0, 0, 1, 1], [], []>} : vector<32x32xf32>, vector<32x128xf32>, vector<32x128xf32> -> vector<32x128xf32>
    %cst_33 = arith.constant dense<0.000000e+00> : vector<32x128xf32>
    %44 = tpu.matmul %29, %40, %cst_33 {dimension_numbers = #tpu.dot_dimension_numbers<[1], [0], [0], [1], [0, 0, 1, 1], [], []>} : vector<32x32xf32>, vector<32x128xf32>, vector<32x128xf32> -> vector<32x128xf32>
    %45 = tpu.concatenate %40, %43, %44 in 1 : vector<32x128xf32>, vector<32x128xf32>, vector<32x128xf32> -> vector<32x384xf32>
    %cst_34 = arith.constant dense<0.000000e+00> : vector<32x24xf32>
    %46 = tpu.matmul %45, %41, %cst_34 {dimension_numbers = #tpu.dot_dimension_numbers<[1], [0], [0], [1], [0, 0, 1, 1], [], []>} : vector<32x384xf32>, vector<384x24xf32>, vector<32x24xf32> -> vector<32x24xf32>
    %47 = vector.broadcast %42 : vector<1x24xf32> to vector<32x24xf32>
    %48 = arith.addf %46, %47 : vector<32x24xf32>
    %49 = vector.extract_strided_slice %48 {offsets = [0, 0], sizes = [16, 24], strides = [1, 1]} : vector<32x24xf32> to vector<16x24xf32>
    %50 = tpu.transpose %49, [1, 0] : vector<16x24xf32> -> vector<24x16xf32>
    %51 = vector.extract_strided_slice %48 {offsets = [16, 0], sizes = [16, 24], strides = [1, 1]} : vector<32x24xf32> to vector<16x24xf32>
    %52 = tpu.transpose %51, [1, 0] : vector<16x24xf32> -> vector<24x16xf32>
    %53 = tpu.concatenate %50, %52 in 0 : vector<24x16xf32>, vector<24x16xf32> -> vector<48x16xf32>
    %c0_35 = arith.constant 0 : index
    %c0_36 = arith.constant 0 : index
    %54 = vector.load %arg13[%c0_35, %c0_36] : memref<48x16xf32, #tpu.memory_space<vmem>>, vector<48x16xf32>
    tpu.vector_store %arg13[%c0_35, %c0_36], %53 {strides = array<i32>} : memref<48x16xf32, #tpu.memory_space<vmem>>, vector<48x16xf32>,
    return
  }
  func.func @transform_0(%arg0: i32) -> (i32, i32) {
    %c0_i32 = arith.constant 0 : i32
    %c0_i32_0 = arith.constant 0 : i32
    return %arg0, %c0_i32 : i32, i32
  }
  func.func @transform_1(%arg0: i32) -> (i32, i32) {
    %c0_i32 = arith.constant 0 : i32
    %c0_i32_0 = arith.constant 0 : i32
    return %arg0, %c0_i32 : i32, i32
  }
  func.func @transform_2(%arg0: i32) -> (i32, i32) {
    %c0_i32 = arith.constant 0 : i32
    %c0_i32_0 = arith.constant 0 : i32
    %c0_i32_1 = arith.constant 0 : i32
    return %c0_i32, %c0_i32_0 : i32, i32
  }
  func.func @transform_3(%arg0: i32) -> (i32, i32) {
    %c0_i32 = arith.constant 0 : i32
    %c0_i32_0 = arith.constant 0 : i32
    %c0_i32_1 = arith.constant 0 : i32
    return %c0_i32, %c0_i32_0 : i32, i32
  }
  func.func @transform_4(%arg0: i32) -> (i32, i32) {
    %c0_i32 = arith.constant 0 : i32
    %c0_i32_0 = arith.constant 0 : i32
    %c0_i32_1 = arith.constant 0 : i32
    return %c0_i32, %c0_i32_0 : i32, i32
  }
  func.func @transform_5(%arg0: i32) -> (i32, i32) {
    %c0_i32 = arith.constant 0 : i32
    %c0_i32_0 = arith.constant 0 : i32
    %c0_i32_1 = arith.constant 0 : i32
    return %c0_i32, %c0_i32_0 : i32, i32
  }
  func.func @transform_6(%arg0: i32) -> (i32, i32) {
    %c0_i32 = arith.constant 0 : i32
    %c0_i32_0 = arith.constant 0 : i32
    %c0_i32_1 = arith.constant 0 : i32
    return %c0_i32, %c0_i32_0 : i32, i32
  }
  func.func @transform_7(%arg0: i32) -> (i32, i32) {
    %c0_i32 = arith.constant 0 : i32
    %c0_i32_0 = arith.constant 0 : i32
    %c0_i32_1 = arith.constant 0 : i32
    return %c0_i32, %c0_i32_0 : i32, i32
  }
  func.func @transform_8(%arg0: i32) -> (i32, i32) {
    %c0_i32 = arith.constant 0 : i32
    %c0_i32_0 = arith.constant 0 : i32
    %c0_i32_1 = arith.constant 0 : i32
    return %c0_i32, %c0_i32_0 : i32, i32
  }
  func.func @transform_9(%arg0: i32) -> (i32, i32) {
    %c0_i32 = arith.constant 0 : i32
    %c0_i32_0 = arith.constant 0 : i32
    %c0_i32_1 = arith.constant 0 : i32
    return %c0_i32, %c0_i32_0 : i32, i32
  }
  func.func @transform_10(%arg0: i32) -> (i32, i32) {
    %c0_i32 = arith.constant 0 : i32
    %c0_i32_0 = arith.constant 0 : i32
    %c0_i32_1 = arith.constant 0 : i32
    return %c0_i32, %c0_i32_0 : i32, i32
  }
  func.func @transform_11(%arg0: i32) -> (i32, i32) {
    %c0_i32 = arith.constant 0 : i32
    %c0_i32_0 = arith.constant 0 : i32
    %c0_i32_1 = arith.constant 0 : i32
    return %c0_i32, %c0_i32_0 : i32, i32
  }
  func.func @transform_12(%arg0: i32) -> (i32, i32) {
    %c0_i32 = arith.constant 0 : i32
    %c0_i32_0 = arith.constant 0 : i32
    return %arg0, %c0_i32 : i32, i32
  }
}

</mosaic_0001>

<bundles_post_ra>
// kernel: tpu_custom_call.1
= control target key start
LH: loop header
LB: loop body
LE: loop exit
PB: predicated region body
PF: predicated region fallthrough
CT: control target
= control target key end

     0   :  { %17 = vsyncpa [#allocation3], 0  ;;  %s1601_s0 = inlined_call_operand.vmem [shape: f32[48,16], index: 0, kind: input, shape index: {}]   ;;  %s1602_s1 = inlined_call_operand.vmem [shape: f32[48,16], index: 1, kind: input, shape index: {}]   ;;  %s1603_s2 = inlined_call_operand.hbm [shape: f32[16,16], index: 2, kind: input, shape index: {}]   ;;  %s1604_s3 = inlined_call_operand.hbm [shape: f32[16,16], index: 3, kind: input, shape index: {}]   ;;  %s1605_s4 = inlined_call_operand.vmem [shape: f32[32,32], index: 4, kind: input, shape index: {}]   ;;  %s1606_s5 = inlined_call_operand.vmem [shape: f32[32,32], index: 5, kind: input, shape index: {}]   ;;  %s1607_s6 = inlined_call_operand.vmem [shape: f32[72,128], index: 6, kind: input, shape index: {}]   ;;  %s1608_s7 = inlined_call_operand.vmem [shape: f32[1,128], index: 7, kind: input, shape index: {}]   ;;  %s1609_s8 = inlined_call_operand.vmem [shape: f32[384,128], index: 8, kind: input, shape index: {}]   ;;  %s1610_s9 = inlined_call_operand.hbm [shape: f32[1,128], index: 9, kind: input, shape index: {}]   ;;  %s1611_s10 = inlined_call_operand.vmem [shape: f32[384,24], index: 10, kind: input, shape index: {}]   ;;  %s1612_s11 = inlined_call_operand.hbm [shape: f32[1,24], index: 11, kind: input, shape index: {}]   ;;  %s1613_s12 = inlined_call_operand.vmem [shape: f32[48,16], index: 12, kind: output, shape index: {}]  }
   0x1   :  { %18 = vsyncpa [#allocation5], 0 }
   0x2   :  { %19 = vsyncpa [#allocation8], 0  ;;  %s41_s23 = sshll.u32 %s1604_s3, 4  ;;  %s1028_s24 = smov [#allocation4]   ;;  %s42_s23 = int_to_ptr.hbm [resolvable:$true] %s41_s23 }
   0x3   :  { %s43_s25 = sshll.u32 %s1028_s24, 4  ;;  %s28_s28 = sshll.u32 %s1603_s2, 4  ;;  %s44_s25 = int_to_ptr.vmem [resolvable:$true] %s43_s25  ;;  %s29_s28 = int_to_ptr.hbm [resolvable:$true] %s28_s28 }
   0x4   :  { %s1029_s29 = smov 128   ;;  %s1030_s30 = smov 8  }
   0x5   :  { %49 = dma.hbm_to_vmem [thread:$0]  %s42_s23, 256, %s44_s25, [#allocation5], %s1029_s29, %s1029_s29, %s1030_s30  }
   0x6   :  { %s1031_s13 = smov [#allocation2]   ;;  %s65_s17 = sshll.u32 %s1610_s9, 4  ;;  %s66_s17 = int_to_ptr.hbm [resolvable:$true] %s65_s17 }
   0x7   :  { %s30_s14 = sshll.u32 %s1031_s13, 4  ;;  %s78_s19 = sshll.u32 %s1612_s11, 4  ;;  %s31_s14 = int_to_ptr.vmem [resolvable:$true] %s30_s14  ;;  %s79_s19 = int_to_ptr.hbm [resolvable:$true] %s78_s19 }
   0x8   :  { %36 = dma.hbm_to_vmem [thread:$0]  %s29_s28, 256, %s31_s14, [#allocation3], %s1029_s29, %s1029_s29, %s1030_s30  }
   0x9   :  { %s1032_s20 = smov [#allocation6]   ;;  %s1033_s2 = smov [#allocation7]  }
   0xa   :  { %s67_s21 = sshll.u32 %s1032_s20, 4  ;;  %s80_s22 = sshll.u32 %s1033_s2, 4  ;;  %s68_s21 = int_to_ptr.vmem [resolvable:$true] %s67_s21  ;;  %s81_s22 = int_to_ptr.vmem [resolvable:$true] %s80_s22 }
   0xb   :  { %70 = dma.hbm_to_vmem [thread:$0]  %s66_s17, 16, %s68_s21, [#allocation5]  }
   0xc   :  { %83 = dma.hbm_to_vmem [thread:$0]  %s79_s19, 16, %s81_s22, [#allocation8]  }
   0xd   :  { %1022 = dma.done.wait [#allocation3], 256  }
   0xe   :  { %1023 = vsyncadd [#allocation3], 4294967040 }
   0xf   :  { %1024 = dma.done.wait [#allocation5], 272  }
  0x10   :  { %1025 = vsyncadd [#allocation5], 4294967024 }
  0x11   :  { %1026 = dma.done.wait [#allocation8], 16  }
  0x12   :  { %1027 = vsyncadd [#allocation8], 4294967280  ;;  %v125_v0 = vld [vmem:[#allocation2 + $0x8] sm:$0xff]  ;;  %v124_v1 = vld [vmem:[#allocation2] sm:$0xff]  ;;  %vm126_vm1 = vcmask 130048   ;;  %vm294_vm7 = vcmask 588800  }
  0x13   :  { %v100_v2 = vld [vmem:[%s1602_s1] sm:$0xff]  ;;  %159 = vmatpush.msra.mxu0 %v125_v0  ;;  %v101_v5 = vld [vmem:[%s1602_s1 + $0x8] sm:$0xff]  ;;  %v181_v6 = vld [vmem:[#allocation4 + $0x8] sm:$0xff]  ;;  %vm397_vm8 = vcmask 261120  }
  0x14   :  { %vm106_vm0 = vcmp.eq.f32.partialorder %v100_v2, 0.0  ;;  %v112_v3 = vld [vmem:[%s1601_s0] sm:$0xff]  ;;  %196 = vmatpush.msra.mxu1 %v181_v6  ;;  %v180_v7 = vld [vmem:[#allocation4] sm:$0xff]  ;;  %v103_v8 = vld [vmem:[%s1602_s1 + $0x18] sm:$0xff]  ;;  %vm107_vm3 = vcmp.eq.f32.partialorder %v101_v5, 0.0 }
  0x15   :  { %v118_v4 = vsel %vm106_vm0, 0.0, %v112_v3  ;;  %160 = vmatpush.msra.mxu0 %v124_v1  ;;  %v115_v9 = vld [vmem:[%s1601_s0 + $0x18] sm:$0xff]  ;;  %vm109_vm2 = vcmp.eq.f32.partialorder %v103_v8, 0.0  ;;  %v113_v11 = vld [vmem:[%s1601_s0 + $0x8] sm:$0xff]  ;;  %v104_v12 = vld [vmem:[%s1602_s1 + $0x20] sm:$0xff] }
  0x16   :  { %852 = vmatmul.msk.f32.vlgmr.msra.gmra.mxu0 %vm126_vm1, %v118_v4  ;;  %217 = vxpose.xlu0.b32.start [1/9] (short) (narrow) %v118_v4, 16  ;;  %v121_v10 = vsel %vm109_vm2, 0.0, %v115_v9  ;;  %v119_v13 = vsel %vm107_vm3, 0.0, %v113_v11  ;;  %vm110_vm4 = vcmp.eq.f32.partialorder %v104_v12, 0.0  ;;  %v116_v14 = vld [vmem:[%s1601_s0 + $0x20] sm:$0xff]  ;;  %v102_v15 = vld [vmem:[%s1602_s1 + $0x10] sm:$0xff] }
  0x17   :  { %197 = vmatpush.msra.mxu1 %v180_v7  ;;  %249 = vxpose.xlu1.b32.start [1/9] (short) (narrow) %v121_v10, 16  ;;  %v122_v16 = vsel %vm110_vm4, 0.0, %v116_v14  ;;  %vm108_vm5 = vcmp.eq.f32.partialorder %v102_v15, 0.0  ;;  %v114_v17 = vld [vmem:[%s1601_s0 + $0x10] sm:$0xff]  ;;  %v105_v18 = vld [vmem:[%s1602_s1 + $0x28] sm:$0xff]  ;;  %v289_v30 = vld [vmem:[%s1607_s6 + $0x40] sm:$0xff] }
  0x18   :  { %858 = vmatmul.msk.f32.vlgmr.msra.gmra.mxu1 %vm126_vm1, %v118_v4  ;;  %v120_v19 = vsel %vm108_vm5, 0.0, %v114_v17  ;;  %vm111_vm6 = vcmp.eq.f32.partialorder %v105_v18, 0.0  ;;  %v117_v20 = vld [vmem:[%s1601_s0 + $0x28] sm:$0xff]  ;;  %v288_v31 = vld [vmem:[%s1607_s6 + $0x38] sm:$0xff]  ;;  %314 = vmatpush.msra.mxu2 %v289_v30  ;;  %v287_v32 = vld [vmem:[%s1607_s6 + $0x30] sm:$0xff] }
  0x19   :  { %v123_v21 = vsel %vm111_vm6, 0.0, %v117_v20  ;;  %v286_v33 = vld [vmem:[%s1607_s6 + $0x28] sm:$0xff]  ;;  %v285_v34 = vld [vmem:[%s1607_s6 + $0x20] sm:$0xff]  ;;  %v284_v36 = vld [vmem:[%s1607_s6 + $0x18] sm:$0xff] }
  0x1a   :  { %315 = vmatpush.msra.mxu2 %v288_v31  ;;  %v283_v38 = vld [vmem:[%s1607_s6 + $0x10] sm:$0xff]  ;;  %v282_v39 = vld [vmem:[%s1607_s6 + $0x8] sm:$0xff]  ;;  %v281_v40 = vld [vmem:[%s1607_s6] sm:$0xff] }
  0x1b   :  { %v363_v44 = vld [vmem:[%s1609_s8 + $0x78] sm:$0xff]  ;;  %v362_v45 = vld [vmem:[%s1609_s8 + $0x70] sm:$0xff]  ;;  %v361_v46 = vld [vmem:[%s1609_s8 + $0x68] sm:$0xff] }
  0x1c   :  { %316 = vmatpush.msra.mxu2 %v287_v32  ;;  %v360_v47 = vld [vmem:[%s1609_s8 + $0x60] sm:$0xff]  ;;  %v359_v48 = vld [vmem:[%s1609_s8 + $0x58] sm:$0xff]  ;;  %v358_v50 = vld [vmem:[%s1609_s8 + $0x50] sm:$0xff] }
  0x1d   :  { %v357_v51 = vld [vmem:[%s1609_s8 + $0x48] sm:$0xff]  ;;  %v356_v52 = vld [vmem:[%s1609_s8 + $0x40] sm:$0xff]  ;;  %v355_v53 = vld [vmem:[%s1609_s8 + $0x38] sm:$0xff] }
  0x1e   :  { %853 = vmatmul.msk.f32.gmra.mxu0 %vm126_vm1, %v119_v13  ;;  %218 = vxpose.xlu0.b32.cont [2/9] (short) (narrow) %v119_v13, 16  ;;  %v354_v54 = vld [vmem:[%s1609_s8 + $0x30] sm:$0xff]  ;;  %v353_v55 = vld [vmem:[%s1609_s8 + $0x28] sm:$0xff]  ;;  %v352_v56 = vld [vmem:[%s1609_s8 + $0x20] sm:$0xff] }
  0x1f   :  { %250 = vxpose.xlu1.b32.cont [2/9] (short) (narrow) %v122_v16, 16  ;;  %317 = vmatpush.msra.mxu2 %v286_v33  ;;  %v351_v57 = vld [vmem:[%s1609_s8 + $0x18] sm:$0xff]  ;;  %v350_v60 = vld [vmem:[%s1609_s8 + $0x10] sm:$0xff]  ;;  %v349_v61 = vld [vmem:[%s1609_s8 + $0x8] sm:$0xff] }
  0x20   :  { %859 = vmatmul.msk.f32.gmra.mxu1 %vm126_vm1, %v119_v13  ;;  %v348_v62 = vld [vmem:[%s1609_s8] sm:$0xff]  ;;  %v1270_v13 = vld [vmem:[%s1605_s4 + $0x8] sm:$0xff]  ;;  %v1278_v14 = vld [vmem:[%s1605_s4 + $0x10] sm:$0xff] }
  0x21   :  { %318 = vmatpush.msra.mxu2 %v285_v34  ;;  %v923_v63 = vld [vmem:[%s1608_s7] ss:$0 sm:$0xff]  ;;  %v1285_v15 = vld [vmem:[%s1605_s4 + $0x18] sm:$0xff]  ;;  %v1299_v17 = vld [vmem:[%s1606_s5 + $0x8] sm:$0xff] }
  0x22   :  { %v1259_v12 = vld [vmem:[%s1605_s4] sm:$0xff]  ;;  %v1306_v18 = vld [vmem:[%s1606_s5 + $0x10] sm:$0xff]  ;;  %v379_v20 = vld [vmem:[%s1609_s8 + $0xf8] sm:$0xff] }
  0x23   :  { %319 = vmatpush.msra.mxu2 %v284_v36  ;;  %512 = vmatpush.msrb.mxu0 %v379_v20  ;;  %v369_v30 = vld [vmem:[%s1609_s8 + $0xa8] sm:$0xff]  ;;  %v368_v31 = vld [vmem:[%s1609_s8 + $0xa0] sm:$0xff]  ;;  %v367_v32 = vld [vmem:[%s1609_s8 + $0x98] sm:$0xff] }
  0x24   :  { %v366_v33 = vld [vmem:[%s1609_s8 + $0x90] sm:$0xff]  ;;  %v365_v34 = vld [vmem:[%s1609_s8 + $0x88] sm:$0xff]  ;;  %v395_v36 = vld [vmem:[%s1609_s8 + $0x178] sm:$0xff] }
  0x25   :  { %320 = vmatpush.msra.mxu2 %v283_v38  ;;  %541 = vmatpush.msrb.mxu1 %v395_v36  ;;  %v393_v38 = vld [vmem:[%s1609_s8 + $0x168] sm:$0xff]  ;;  %v581_v20 = vld [vmem:[%s1611_s10 + $0x18] sm:$0xff] }
  0x26   :  { %854 = vmatmul.msk.f32.gmra.mxu0 %vm126_vm1, %v120_v19  ;;  %219 = vxpose.xlu0.b32.cont [3/9] (short) (narrow) %v120_v19, 16 }
  0x27   :  { %251 = vxpose.xlu1.b32.cont [3/9] (short) (narrow) %v123_v21, 16  ;;  %321 = vmatpush.msra.mxu2 %v282_v39  ;;  %v392_v39 = vld [vmem:[%s1609_s8 + $0x160] sm:$0xff] }
  0x28   :  { %860 = vmatmul.msk.f32.gmra.mxu1 %vm126_vm1, %v120_v19  ;;  %v1313_v19 = vld [vmem:[%s1606_s5 + $0x18] sm:$0xff] }
  0x29   :  { %322 = vmatpush.msra.mxu2 %v281_v40  ;;  %v391_v40 = vld [vmem:[%s1609_s8 + $0x158] sm:$0xff] }
  0x2b   :  { %483 = vmatpush.msrb.mxu2 %v363_v44  ;;  %v387_v44 = vld [vmem:[%s1609_s8 + $0x138] sm:$0xff] }
  0x2d   :  { %484 = vmatpush.msrb.mxu2 %v362_v45  ;;  %v386_v45 = vld [vmem:[%s1609_s8 + $0x130] sm:$0xff] }
  0x2e   :  { %855 = vmatmul.msk.f32.gmra.mxu0 %vm126_vm1, %v121_v10 }
  0x2f   :  { %485 = vmatpush.msrb.mxu2 %v361_v46  ;;  %v385_v46 = vld [vmem:[%s1609_s8 + $0x128] sm:$0xff] }
  0x30   :  { %861 = vmatmul.msk.f32.gmra.mxu1 %vm126_vm1, %v121_v10 }
  0x31   :  { %486 = vmatpush.msrb.mxu2 %v360_v47  ;;  %v384_v47 = vld [vmem:[%s1609_s8 + $0x120] sm:$0xff] }
  0x33   :  { %487 = vmatpush.msrb.mxu2 %v359_v48  ;;  %v383_v48 = vld [vmem:[%s1609_s8 + $0x118] sm:$0xff] }
  0x35   :  { %488 = vmatpush.msrb.mxu2 %v358_v50  ;;  %v381_v50 = vld [vmem:[%s1609_s8 + $0x108] sm:$0xff] }
  0x36   :  { %856 = vmatmul.msk.f32.gmra.mxu0 %vm126_vm1, %v122_v16 }
  0x37   :  { %489 = vmatpush.msrb.mxu2 %v357_v51 }
  0x38   :  { %862 = vmatmul.msk.f32.gmra.mxu1 %vm126_vm1, %v122_v16  ;;  %v1292_v16 = vld [vmem:[%s1606_s5] sm:$0xff] }
  0x39   :  { %490 = vmatpush.msrb.mxu2 %v356_v52  ;;  %v380_v52 = vld [vmem:[%s1609_s8 + $0x100] sm:$0xff] }
  0x3b   :  { %491 = vmatpush.msrb.mxu2 %v355_v53 }
  0x3d   :  { %492 = vmatpush.msrb.mxu2 %v354_v54 }
  0x3e   :  { %857 = vmatmul.msk.f32.gmra.mxu0 %vm126_vm1, %v123_v21 }
  0x3f   :  { %493 = vmatpush.msrb.mxu2 %v353_v55 }
  0x40   :  { %863 = vmatmul.msk.f32.gmra.mxu1 %vm126_vm1, %v123_v21  ;;  %v378_v21 = vld [vmem:[%s1609_s8 + $0xf0] sm:$0xff] }
  0x41   :  { %494 = vmatpush.msrb.mxu2 %v352_v56  ;;  %513 = vmatpush.msrb.mxu0 %v378_v21  ;;  %v580_v21 = vld [vmem:[%s1611_s10 + $0x10] sm:$0xff] }
  0x43   :  { %495 = vmatpush.msrb.mxu2 %v351_v57 }
  0x45   :  { %496 = vmatpush.msrb.mxu2 %v350_v60  ;;  %v593_v60 = vld [vmem:[%s1611_s10 + $0x78] sm:$0xff] }
  0x47   :  { %497 = vmatpush.msrb.mxu2 %v349_v61  ;;  %v592_v61 = vld [vmem:[%s1611_s10 + $0x70] sm:$0xff] }
  0x49   :  { %498 = vmatpush.msrb.mxu2 %v348_v62  ;;  %v591_v62 = vld [vmem:[%s1611_s10 + $0x68] sm:$0xff] }
  0x93   :  { %v162_v22 = vpop.f32.mrf.mxu0 }
  0x94   :  { %220 = vxpose.xlu0.b32.cont [4/9] (short) (narrow) %v162_v22, 16  ;;  %v377_v22 = vld [vmem:[%s1609_s8 + $0xe8] sm:$0xff] }
  0x95   :  { %v199_v24 = vpop.f32.mrf.mxu1  ;;  %514 = vmatpush.msrb.mxu0 %v377_v22  ;;  %v579_v22 = vld [vmem:[%s1611_s10 + $0x8] sm:$0xff] }
  0x9b   :  { %v165_v23 = vpop.f32.mrf.mxu0 }
  0x9c   :  { %221 = vxpose.xlu0.b32.cont [5/9] (short) (narrow) %v165_v23, 16  ;;  %v376_v23 = vld [vmem:[%s1609_s8 + $0xe0] sm:$0xff] }
  0x9d   :  { %v202_v26 = vpop.f32.mrf.mxu1  ;;  %515 = vmatpush.msrb.mxu0 %v376_v23  ;;  %v578_v23 = vld [vmem:[%s1611_s10] sm:$0xff] }
  0xa3   :  { %v168_v25 = vpop.f32.mrf.mxu0 }
  0xa4   :  { %222 = vxpose.xlu0.b32.cont [6/9] (short) (narrow) %v168_v25, 16  ;;  %v374_v25 = vld [vmem:[%s1609_s8 + $0xd0] sm:$0xff] }
  0xa5   :  { %v205_v29 = vpop.f32.mrf.mxu1 }
  0xab   :  { %v171_v27 = vpop.f32.mrf.mxu0 }
  0xac   :  { %223 = vxpose.xlu0.b32.cont [7/9] (short) (narrow) %v199_v24, 16  ;;  %252 = vxpose.xlu1.b32.cont [4/9] (short) (narrow) %v171_v27, 16  ;;  %v375_v24 = vld [vmem:[%s1609_s8 + $0xd8] sm:$0xff]  ;;  %v372_v27 = vld [vmem:[%s1609_s8 + $0xc0] sm:$0xff] }
  0xad   :  { %v208_v37 = vpop.f32.mrf.mxu1  ;;  %516 = vmatpush.msrb.mxu0 %v375_v24 }
  0xaf   :  { %517 = vmatpush.msrb.mxu0 %v374_v25 }
  0xb3   :  { %v174_v28 = vpop.f32.mrf.mxu0 }
  0xb4   :  { %224 = vxpose.xlu0.b32.cont [8/9] (short) (narrow) %v202_v26, 16  ;;  %253 = vxpose.xlu1.b32.cont [5/9] (short) (narrow) %v174_v28, 16  ;;  %v373_v26 = vld [vmem:[%s1609_s8 + $0xc8] sm:$0xff]  ;;  %v371_v28 = vld [vmem:[%s1609_s8 + $0xb8] sm:$0xff] }
  0xb5   :  { %v211_v41 = vpop.f32.mrf.mxu1  ;;  %518 = vmatpush.msrb.mxu0 %v373_v26  ;;  %v924_v26 = vld [vmem:[#allocation6] ss:$0 sm:$0xff] }
  0xb7   :  { %519 = vmatpush.msrb.mxu0 %v372_v27 }
  0xb9   :  { %520 = vmatpush.msrb.mxu0 %v371_v28 }
  0xbb   :  { %v177_v35 = vpop.f32.mrf.mxu0 }
  0xbc   :  { %225 = vxpose.xlu0.b32.end [9/9] (short) (narrow) %v205_v29, 16  ;;  %254 = vxpose.xlu1.b32.cont [6/9] (short) (narrow) %v177_v35, 16  ;;  %v370_v29 = vld [vmem:[%s1609_s8 + $0xb0] sm:$0xff]  ;;  %v364_v35 = vld [vmem:[%s1609_s8 + $0x80] sm:$0xff] }
  0xbd   :  { %v214_v42 = vpop.f32.mrf.mxu1  ;;  %521 = vmatpush.msrb.mxu0 %v370_v29 }
  0xbf   :  { %522 = vmatpush.msrb.mxu0 %v369_v30 }
  0xc1   :  { %523 = vmatpush.msrb.mxu0 %v368_v31 }
  0xc3   :  { %524 = vmatpush.msrb.mxu0 %v367_v32 }
  0xc4   :  { %255 = vxpose.xlu1.b32.cont [7/9] (short) (narrow) %v208_v37, 16  ;;  %v394_v37 = vld [vmem:[%s1609_s8 + $0x170] sm:$0xff] }
  0xc5   :  { %525 = vmatpush.msrb.mxu0 %v366_v33  ;;  %542 = vmatpush.msrb.mxu1 %v394_v37 }
  0xc7   :  { %526 = vmatpush.msrb.mxu0 %v365_v34  ;;  %543 = vmatpush.msrb.mxu1 %v393_v38 }
  0xc9   :  { %527 = vmatpush.msrb.mxu0 %v364_v35  ;;  %544 = vmatpush.msrb.mxu1 %v392_v39 }
  0xcb   :  { %545 = vmatpush.msrb.mxu1 %v391_v40  ;;  %688 = vmatpush.msra.mxu0 %v593_v60  ;;  %v618_v60 = vld [vmem:[%s1611_s10 + $0x140] sm:$0xff] }
  0xcc   :  { %256 = vxpose.xlu1.b32.cont [8/9] (short) (narrow) %v211_v41, 16  ;;  %v390_v41 = vld [vmem:[%s1609_s8 + $0x150] sm:$0xff] }
  0xcd   :  { %546 = vmatpush.msrb.mxu1 %v390_v41  ;;  %689 = vmatpush.msra.mxu0 %v592_v61  ;;  %v601_v61 = vld [vmem:[%s1611_s10 + $0xb8] sm:$0xff] }
  0xcf   :  { %690 = vmatpush.msra.mxu0 %v591_v62  ;;  %v617_v62 = vld [vmem:[%s1611_s10 + $0x138] sm:$0xff] }
  0xd4   :  { %257 = vxpose.xlu1.b32.end [9/9] (short) (narrow) %v214_v42, 16  ;;  %v389_v42 = vld [vmem:[%s1609_s8 + $0x148] sm:$0xff] }
  0xd5   :  { %547 = vmatpush.msrb.mxu1 %v389_v42 }
 0x120   :  { %v233_v43 = vpop.trf.xlu0 }
 0x121   :  { %864 = vmatmul.msk.f32.vlgmr.msra.gmra.mxu2 %vm294_vm7, %v233_v43  ;;  %v388_v43 = vld [vmem:[%s1609_s8 + $0x140] sm:$0xff] }
 0x122   :  { %548 = vmatpush.msrb.mxu1 %v388_v43 }
 0x124   :  { %549 = vmatpush.msrb.mxu1 %v387_v44 }
 0x126   :  { %550 = vmatpush.msrb.mxu1 %v386_v45 }
 0x128   :  { %v234_v49 = vpop.trf.xlu0  ;;  %551 = vmatpush.msrb.mxu1 %v385_v46 }
 0x129   :  { %865 = vmatmul.msk.f32.gmra.mxu2 %vm294_vm7, %v234_v49  ;;  %v382_v49 = vld [vmem:[%s1609_s8 + $0x110] sm:$0xff] }
 0x12a   :  { %552 = vmatpush.msrb.mxu1 %v384_v47 }
 0x12c   :  { %553 = vmatpush.msrb.mxu1 %v383_v48 }
 0x12e   :  { %554 = vmatpush.msrb.mxu1 %v382_v49 }
 0x130   :  { %555 = vmatpush.msrb.mxu1 %v381_v50 }
 0x132   :  { %556 = vmatpush.msrb.mxu1 %v380_v52 }
 0x138   :  { %v265_v58 = vpop.trf.xlu1 }
 0x139   :  { %866 = vmatmul.msk.f32.gmra.mxu2 %vm294_vm7, %v265_v58 }
 0x140   :  { %v266_v59 = vpop.trf.xlu1 }
 0x141   :  { %867 = vmatmul.msk.f32.gmra.mxu2 %vm294_vm7, %v266_v59 }
 0x1a4   :  { %v324_v0 = vpop.f32.mrf.mxu2 }
 0x1a5   :  { %v325_v1 = vadd.f32 %v923_v63, %v324_v0  ;;  %v589_v0 = vld [vmem:[%s1611_s10 + $0x58] sm:$0xff] }
 0x1a7   :  { %v1241_v2 = vmax.f32 %v325_v1, 0.0  ;;  %v588_v1 = vld [vmem:[%s1611_s10 + $0x50] sm:$0xff] }
 0x1a9   :  { %499 = vmatmul.f32.vlgmr.msrb.gmra.mxu2 %v1241_v2 }
 0x1ac   :  { %v327_v3 = vpop.f32.mrf.mxu2 }
 0x1ad   :  { %v328_v4 = vadd.f32 %v923_v63, %v327_v3  ;;  %v587_v3 = vld [vmem:[%s1611_s10 + $0x48] sm:$0xff] }
 0x1af   :  { %v1244_v5 = vmax.f32 %v328_v4, 0.0  ;;  %v586_v4 = vld [vmem:[%s1611_s10 + $0x40] sm:$0xff] }
 0x1b1   :  { %502 = vmatmul.f32.gmra.mxu2 %v1244_v5 }
 0x1bc   :  { %v330_v6 = vpop.f32.mrf.mxu2 }
 0x1bd   :  { %v331_v7 = vadd.f32 %v923_v63, %v330_v6  ;;  %v585_v6 = vld [vmem:[%s1611_s10 + $0x38] sm:$0xff] }
 0x1bf   :  { %v1247_v8 = vmax.f32 %v331_v7, 0.0  ;;  %v584_v7 = vld [vmem:[%s1611_s10 + $0x30] sm:$0xff] }
 0x1c1   :  { %505 = vmatmul.f32.gmra.mxu2 %v1247_v8 }
 0x1c4   :  { %v333_v9 = vpop.f32.mrf.mxu2 }
 0x1c5   :  { %v334_v10 = vadd.f32 %v923_v63, %v333_v9  ;;  %v590_v63 = vld [vmem:[%s1611_s10 + $0x60] sm:$0xff]  ;;  %v583_v9 = vld [vmem:[%s1611_s10 + $0x28] sm:$0xff] }
 0x1c6   :  { %691 = vmatpush.msra.mxu0 %v590_v63  ;;  %v600_v63 = vld [vmem:[%s1611_s10 + $0xb0] sm:$0xff] }
 0x1c7   :  { %v1250_v11 = vmax.f32 %v334_v10, 0.0  ;;  %v582_v10 = vld [vmem:[%s1611_s10 + $0x20] sm:$0xff] }
 0x1c8   :  { %692 = vmatpush.msra.mxu0 %v589_v0  ;;  %v616_v0 = vld [vmem:[%s1611_s10 + $0x130] sm:$0xff] }
 0x1c9   :  { %422 = vmatpush.msra.mxu3 %v1250_v11  ;;  %508 = vmatmul.f32.gmra.mxu2 %v1250_v11 }
 0x1ca   :  { %693 = vmatpush.msra.mxu0 %v588_v1  ;;  %v599_v1 = vld [vmem:[%s1611_s10 + $0xa8] sm:$0xff] }
 0x1cb   :  { %423 = vmatpush.msra.mxu3 %v1247_v8 }
 0x1cc   :  { %694 = vmatpush.msra.mxu0 %v587_v3  ;;  %v615_v3 = vld [vmem:[%s1611_s10 + $0x128] sm:$0xff] }
 0x1cd   :  { %424 = vmatpush.msra.mxu3 %v1244_v5 }
 0x1ce   :  { %695 = vmatpush.msra.mxu0 %v586_v4  ;;  %v598_v4 = vld [vmem:[%s1611_s10 + $0xa0] sm:$0xff] }
 0x1cf   :  { %425 = vmatpush.msra.mxu3 %v1241_v2 }
 0x1d0   :  { %868 = vmatmul.msk.f32.vlgmr.msra.gmra.mxu3 %vm397_vm8, %v1259_v12  ;;  %696 = vmatpush.msra.mxu0 %v585_v6  ;;  %v614_v6 = vld [vmem:[%s1611_s10 + $0x120] sm:$0xff] }
 0x1d1   :  { %463 = vmatpush.msrb.mxu3 %v1250_v11 }
 0x1d2   :  { %697 = vmatpush.msra.mxu0 %v584_v7  ;;  %v597_v7 = vld [vmem:[%s1611_s10 + $0x98] sm:$0xff] }
 0x1d3   :  { %464 = vmatpush.msrb.mxu3 %v1247_v8 }
 0x1d4   :  { %698 = vmatpush.msra.mxu0 %v583_v9  ;;  %v613_v9 = vld [vmem:[%s1611_s10 + $0x118] sm:$0xff] }
 0x1d5   :  { %465 = vmatpush.msrb.mxu3 %v1244_v5 }
 0x1d6   :  { %699 = vmatpush.msra.mxu0 %v582_v10  ;;  %v596_v10 = vld [vmem:[%s1611_s10 + $0x90] sm:$0xff] }
 0x1d7   :  { %466 = vmatpush.msrb.mxu3 %v1241_v2 }
 0x1d8   :  { %869 = vmatmul.msk.f32.gmra.mxu3 %vm397_vm8, %v1270_v13  ;;  %700 = vmatpush.msra.mxu0 %v581_v20  ;;  %v612_v20 = vld [vmem:[%s1611_s10 + $0x110] sm:$0xff] }
 0x1da   :  { %701 = vmatpush.msra.mxu0 %v580_v21  ;;  %v595_v21 = vld [vmem:[%s1611_s10 + $0x88] sm:$0xff] }
 0x1dc   :  { %702 = vmatpush.msra.mxu0 %v579_v22  ;;  %v611_v22 = vld [vmem:[%s1611_s10 + $0x108] sm:$0xff] }
 0x1de   :  { %703 = vmatpush.msra.mxu0 %v578_v23  ;;  %v594_v23 = vld [vmem:[%s1611_s10 + $0x80] sm:$0xff] }
 0x1e0   :  { %870 = vmatmul.msk.f32.gmra.mxu3 %vm397_vm8, %v1278_v14 }
 0x1e8   :  { %871 = vmatmul.msk.f32.gmra.mxu3 %vm397_vm8, %v1285_v15 }
 0x1f0   :  { %872 = vmatmul.msk.f32.vlgmr.msrb.gmra.mxu3 %vm397_vm8, %v1292_v16 }
 0x1f8   :  { %873 = vmatmul.msk.f32.gmra.mxu3 %vm397_vm8, %v1299_v17 }
 0x200   :  { %874 = vmatmul.msk.f32.gmra.mxu3 %vm397_vm8, %v1306_v18 }
 0x208   :  { %875 = vmatmul.msk.f32.gmra.mxu3 %vm397_vm8, %v1313_v19 }
 0x22c   :  { %v500_v24 = vpop.f32.mrf.mxu2 }
 0x22d   :  { %v501_v27 = vadd.f32 %v924_v26, %v500_v24  ;;  %v610_v24 = vld [vmem:[%s1611_s10 + $0x100] sm:$0xff] }
 0x234   :  { %v503_v28 = vpop.f32.mrf.mxu2 }
 0x235   :  { %v504_v34 = vadd.f32 %v924_v26, %v503_v28 }
 0x244   :  { %v506_v37 = vpop.f32.mrf.mxu2 }
 0x245   :  { %v507_v42 = vadd.f32 %v924_v26, %v506_v37  ;;  %v925_v37 = vld [vmem:[#allocation7] ss:$0 sm:$0xff] }
 0x24c   :  { %v509_v47 = vpop.f32.mrf.mxu2 }
 0x24d   :  { %v510_v50 = vadd.f32 %v924_v26, %v509_v47 }
 0x253   :  { %v427_v51 = vpop.f32.mrf.mxu3 }
 0x254   :  { %528 = vmatmul.f32.vlgmr.msrb.gmra.mxu0 %v427_v51 }
 0x25b   :  { %v430_v53 = vpop.f32.mrf.mxu3 }
 0x25c   :  { %531 = vmatmul.f32.gmra.mxu0 %v430_v53 }
 0x263   :  { %v433_v54 = vpop.f32.mrf.mxu3 }
 0x264   :  { %534 = vmatmul.f32.gmra.mxu0 %v433_v54 }
 0x26b   :  { %v436_v55 = vpop.f32.mrf.mxu3 }
 0x26c   :  { %537 = vmatmul.f32.gmra.mxu0 %v436_v55 }
 0x273   :  { %v468_v56 = vpop.f32.mrf.mxu3 }
 0x274   :  { %557 = vmatmul.f32.vlgmr.msrb.gmra.mxu1 %v468_v56  ;;  %v603_v56 = vld [vmem:[%s1611_s10 + $0xc8] sm:$0xff] }
 0x27b   :  { %v471_v57 = vpop.f32.mrf.mxu3 }
 0x27c   :  { %560 = vmatmul.f32.gmra.mxu1 %v471_v57  ;;  %v620_v57 = vld [vmem:[%s1611_s10 + $0x150] sm:$0xff] }
 0x283   :  { %v474_v58 = vpop.f32.mrf.mxu3 }
 0x284   :  { %563 = vmatmul.f32.gmra.mxu1 %v474_v58  ;;  %v619_v58 = vld [vmem:[%s1611_s10 + $0x148] sm:$0xff] }
 0x28b   :  { %v477_v59 = vpop.f32.mrf.mxu3 }
 0x28c   :  { %566 = vmatmul.f32.gmra.mxu1 %v477_v59  ;;  %v602_v59 = vld [vmem:[%s1611_s10 + $0xc0] sm:$0xff] }
 0x2d1   :  { %v529_v25 = vpop.f32.mrf.mxu0 }
 0x2d2   :  { %v530_v29 = vadd.f32 %v529_v25, %v501_v27 }
 0x2d9   :  { %v532_v30 = vpop.f32.mrf.mxu0 }
 0x2da   :  { %v533_v36 = vadd.f32 %v532_v30, %v504_v34 }
 0x2e1   :  { %v535_v40 = vpop.f32.mrf.mxu0 }
 0x2e2   :  { %v536_v44 = vadd.f32 %v535_v40, %v507_v42 }
 0x2e9   :  { %v538_v49 = vpop.f32.mrf.mxu0 }
 0x2ea   :  { %v539_v51 = vadd.f32 %v538_v49, %v510_v50 }
 0x2f1   :  { %v558_v31 = vpop.f32.mrf.mxu1 }
 0x2f2   :  { %v559_v32 = vadd.f32 %v558_v31, %v530_v29 }
 0x2f4   :  { %v570_v33 = vmax.f32 %v559_v32, 0.0 }
 0x2f6   :  { %v574_v35 = vadd.f32 %v570_v33, %v1241_v2 }
 0x2f8   :  { %704 = vmatmul.f32.vlgmr.msra.gmra.mxu0 %v574_v35 }
 0x2f9   :  { %v561_v38 = vpop.f32.mrf.mxu1 }
 0x2fa   :  { %v562_v39 = vadd.f32 %v561_v38, %v533_v36 }
 0x2fc   :  { %v571_v41 = vmax.f32 %v562_v39, 0.0 }
 0x2fe   :  { %v575_v43 = vadd.f32 %v571_v41, %v1244_v5  ;;  %v609_v5 = vld [vmem:[%s1611_s10 + $0xf8] sm:$0xff] }
 0x2ff   :  { %717 = vmatpush.msra.mxu1 %v609_v5 }
 0x300   :  { %707 = vmatmul.f32.gmra.mxu0 %v575_v43 }
 0x301   :  { %v564_v45 = vpop.f32.mrf.mxu1 }
 0x302   :  { %v565_v46 = vadd.f32 %v564_v45, %v536_v44 }
 0x304   :  { %v572_v48 = vmax.f32 %v565_v46, 0.0 }
 0x306   :  { %v576_v2 = vadd.f32 %v572_v48, %v1247_v8  ;;  %v625_v8 = vld [vmem:[%s1611_s10 + $0x178] sm:$0xff] }
 0x307   :  { %746 = vmatpush.msrb.mxu0 %v625_v8 }
 0x308   :  { %710 = vmatmul.f32.gmra.mxu0 %v576_v2 }
 0x309   :  { %v567_v52 = vpop.f32.mrf.mxu1 }
 0x30a   :  { %v568_v53 = vadd.f32 %v567_v52, %v539_v51 }
 0x30c   :  { %v573_v54 = vmax.f32 %v568_v53, 0.0 }
 0x30e   :  { %v577_v55 = vadd.f32 %v573_v54, %v1250_v11  ;;  %v608_v11 = vld [vmem:[%s1611_s10 + $0xf0] sm:$0xff] }
 0x30f   :  { %718 = vmatpush.msra.mxu1 %v608_v11 }
 0x310   :  { %639 = vmatpush.msra.mxu3 %v577_v55  ;;  %668 = vmatpush.msra.mxu2 %v577_v55 }
 0x311   :  { %713 = vmatmul.f32.gmra.mxu0 %v577_v55 }
 0x312   :  { %640 = vmatpush.msra.mxu3 %v576_v2  ;;  %669 = vmatpush.msra.mxu2 %v576_v2 }
 0x314   :  { %641 = vmatpush.msra.mxu3 %v575_v43  ;;  %670 = vmatpush.msra.mxu2 %v575_v43 }
 0x316   :  { %642 = vmatpush.msra.mxu3 %v574_v35  ;;  %671 = vmatpush.msra.mxu2 %v574_v35 }
 0x317   :  { %876 = vmatmul.msk.f32.vlgmr.msra.gmra.mxu3 %vm397_vm8, %v1259_v12  ;;  %880 = vmatmul.msk.f32.vlgmr.msra.gmra.mxu2 %vm397_vm8, %v1292_v16  ;;  %v607_v12 = vld [vmem:[%s1611_s10 + $0xe8] sm:$0xff]  ;;  %v622_v16 = vld [vmem:[%s1611_s10 + $0x160] sm:$0xff] }
 0x318   :  { %884 = vmatpush.msrb.mxu2 %v625_v8  ;;  %885 = vmatpush.msrb.mxu3 %v625_v8 }
 0x319   :  { %719 = vmatpush.msra.mxu1 %v607_v12 }
 0x31f   :  { %877 = vmatmul.msk.f32.gmra.mxu3 %vm397_vm8, %v1270_v13  ;;  %881 = vmatmul.msk.f32.gmra.mxu2 %vm397_vm8, %v1299_v17  ;;  %v624_v13 = vld [vmem:[%s1611_s10 + $0x170] sm:$0xff]  ;;  %v605_v17 = vld [vmem:[%s1611_s10 + $0xd8] sm:$0xff] }
 0x320   :  { %747 = vmatpush.msrb.mxu0 %v624_v13  ;;  %886 = vmatpush.msrb.mxu2 %v624_v13 }
 0x321   :  { %887 = vmatpush.msrb.mxu3 %v624_v13 }
 0x327   :  { %878 = vmatmul.msk.f32.gmra.mxu3 %vm397_vm8, %v1278_v14  ;;  %882 = vmatmul.msk.f32.gmra.mxu2 %vm397_vm8, %v1306_v18  ;;  %v623_v14 = vld [vmem:[%s1611_s10 + $0x168] sm:$0xff]  ;;  %v621_v18 = vld [vmem:[%s1611_s10 + $0x158] sm:$0xff] }
 0x328   :  { %748 = vmatpush.msrb.mxu0 %v623_v14  ;;  %888 = vmatpush.msrb.mxu2 %v623_v14 }
 0x329   :  { %889 = vmatpush.msrb.mxu3 %v623_v14 }
 0x32a   :  { %749 = vmatpush.msrb.mxu0 %v622_v16  ;;  %890 = vmatpush.msrb.mxu2 %v622_v16 }
 0x32b   :  { %891 = vmatpush.msrb.mxu3 %v622_v16 }
 0x32c   :  { %750 = vmatpush.msrb.mxu0 %v621_v18  ;;  %892 = vmatpush.msrb.mxu2 %v621_v18 }
 0x32d   :  { %893 = vmatpush.msrb.mxu3 %v621_v18 }
 0x32e   :  { %751 = vmatpush.msrb.mxu0 %v620_v57  ;;  %894 = vmatpush.msrb.mxu2 %v620_v57 }
 0x32f   :  { %879 = vmatmul.msk.f32.gmra.mxu3 %vm397_vm8, %v1285_v15  ;;  %883 = vmatmul.msk.f32.gmra.mxu2 %vm397_vm8, %v1313_v19  ;;  %v606_v15 = vld [vmem:[%s1611_s10 + $0xe0] sm:$0xff]  ;;  %v604_v19 = vld [vmem:[%s1611_s10 + $0xd0] sm:$0xff] }
 0x330   :  { %720 = vmatpush.msra.mxu1 %v606_v15  ;;  %895 = vmatpush.msrb.mxu3 %v620_v57 }
 0x331   :  { %752 = vmatpush.msrb.mxu0 %v619_v58  ;;  %896 = vmatpush.msrb.mxu2 %v619_v58 }
 0x332   :  { %721 = vmatpush.msra.mxu1 %v605_v17  ;;  %897 = vmatpush.msrb.mxu3 %v619_v58 }
 0x333   :  { %753 = vmatpush.msrb.mxu0 %v618_v60  ;;  %898 = vmatpush.msrb.mxu2 %v618_v60 }
 0x334   :  { %722 = vmatpush.msra.mxu1 %v604_v19  ;;  %899 = vmatpush.msrb.mxu3 %v618_v60 }
 0x335   :  { %754 = vmatpush.msrb.mxu0 %v617_v62  ;;  %900 = vmatpush.msrb.mxu2 %v617_v62 }
 0x336   :  { %723 = vmatpush.msra.mxu1 %v603_v56  ;;  %901 = vmatpush.msrb.mxu3 %v617_v62 }
 0x337   :  { %755 = vmatpush.msrb.mxu0 %v616_v0  ;;  %902 = vmatpush.msrb.mxu2 %v616_v0 }
 0x338   :  { %724 = vmatpush.msra.mxu1 %v602_v59  ;;  %903 = vmatpush.msrb.mxu3 %v616_v0 }
 0x339   :  { %756 = vmatpush.msrb.mxu0 %v615_v3  ;;  %904 = vmatpush.msrb.mxu2 %v615_v3 }
 0x33a   :  { %725 = vmatpush.msra.mxu1 %v601_v61  ;;  %905 = vmatpush.msrb.mxu3 %v615_v3 }
 0x33b   :  { %757 = vmatpush.msrb.mxu0 %v614_v6  ;;  %906 = vmatpush.msrb.mxu2 %v614_v6 }
 0x33c   :  { %726 = vmatpush.msra.mxu1 %v600_v63  ;;  %907 = vmatpush.msrb.mxu3 %v614_v6 }
 0x33d   :  { %758 = vmatpush.msrb.mxu0 %v613_v9  ;;  %908 = vmatpush.msrb.mxu2 %v613_v9 }
 0x33e   :  { %727 = vmatpush.msra.mxu1 %v599_v1  ;;  %909 = vmatpush.msrb.mxu3 %v613_v9 }
 0x33f   :  { %759 = vmatpush.msrb.mxu0 %v612_v20  ;;  %910 = vmatpush.msrb.mxu2 %v612_v20 }
 0x340   :  { %728 = vmatpush.msra.mxu1 %v598_v4  ;;  %911 = vmatpush.msrb.mxu3 %v612_v20 }
 0x341   :  { %760 = vmatpush.msrb.mxu0 %v611_v22  ;;  %912 = vmatpush.msrb.mxu2 %v611_v22 }
 0x342   :  { %729 = vmatpush.msra.mxu1 %v597_v7  ;;  %913 = vmatpush.msrb.mxu3 %v611_v22 }
 0x343   :  { %761 = vmatpush.msrb.mxu0 %v610_v24  ;;  %914 = vmatpush.msrb.mxu2 %v610_v24 }
 0x344   :  { %730 = vmatpush.msra.mxu1 %v596_v10  ;;  %915 = vmatpush.msrb.mxu3 %v610_v24 }
 0x346   :  { %731 = vmatpush.msra.mxu1 %v595_v21 }
 0x348   :  { %732 = vmatpush.msra.mxu1 %v594_v23 }
 0x375   :  { %v705_v33 = vpop.f32.mrf.mxu0 }
 0x376   :  { %v706_v38 = vadd.f32 %v925_v37, %v705_v33 }
 0x37d   :  { %v708_v34 = vpop.f32.mrf.mxu0 }
 0x37e   :  { %v709_v44 = vadd.f32 %v925_v37, %v708_v34 }
 0x385   :  { %v711_v35 = vpop.f32.mrf.mxu0 }
 0x386   :  { %v712_v50 = vadd.f32 %v925_v37, %v711_v35 }
 0x38e   :  { %v714_v36 = vpop.f32.mrf.mxu0 }
 0x38f   :  { %v715_v53 = vadd.f32 %v925_v37, %v714_v36 }
 0x39a   :  { %v644_v25 = vpop.f32.mrf.mxu3  ;;  %v673_v26 = vpop.f32.mrf.mxu2 }
 0x39b   :  { %733 = vmatmul.f32.vlgmr.msra.gmra.mxu1 %v644_v25  ;;  %762 = vmatmul.f32.vlgmr.msrb.gmra.mxu0 %v673_v26 }
 0x3a2   :  { %v647_v27 = vpop.f32.mrf.mxu3  ;;  %v676_v28 = vpop.f32.mrf.mxu2 }
 0x3a3   :  { %736 = vmatmul.f32.gmra.mxu1 %v647_v27  ;;  %765 = vmatmul.f32.vlgmr.msrb.gmra.mxu2 %v676_v28 }
 0x3aa   :  { %v650_v29 = vpop.f32.mrf.mxu3  ;;  %v679_v30 = vpop.f32.mrf.mxu2 }
 0x3ab   :  { %739 = vmatmul.f32.gmra.mxu1 %v650_v29  ;;  %768 = vmatmul.f32.vlgmr.msrb.gmra.mxu3 %v679_v30 }
 0x3b2   :  { %v653_v31 = vpop.f32.mrf.mxu3  ;;  %v682_v32 = vpop.f32.mrf.mxu2 }
 0x3b3   :  { %742 = vmatmul.f32.gmra.mxu1 %v653_v31  ;;  %771 = vmatmul.f32.gmra.mxu3 %v682_v32 }
 0x418   :  { %v734_v39 = vpop.f32.mrf.mxu1  ;;  %v763_v41 = vpop.f32.mrf.mxu0 }
 0x419   :  { %v735_v40 = vadd.f32 %v734_v39, %v706_v38 }
 0x41b   :  { %v764_v42 = vadd.f32 %v763_v41, %v735_v40 }
 0x41d   :  { %775 = vxpose.xlu2.b32.start [1/2] (short) (narrow) %v764_v42, 24 }
 0x420   :  { %v737_v43 = vpop.f32.mrf.mxu1 }
 0x421   :  { %v738_v45 = vadd.f32 %v737_v43, %v709_v44 }
 0x426   :  { %v766_v46 = vpop.f32.mrf.mxu2 }
 0x427   :  { %v767_v47 = vadd.f32 %v766_v46, %v738_v45 }
 0x428   :  { %v740_v48 = vpop.f32.mrf.mxu1 }
 0x429   :  { %776 = vxpose.xlu2.b32.end [2/2] (short) (narrow) %v767_v47, 24  ;;  %v741_v2 = vadd.f32 %v740_v48, %v712_v50 }
 0x42e   :  { %v769_v49 = vpop.f32.mrf.mxu3 }
 0x42f   :  { %v770_v51 = vadd.f32 %v769_v49, %v741_v2 }
 0x430   :  { %v743_v52 = vpop.f32.mrf.mxu1 }
 0x431   :  { %v744_v55 = vadd.f32 %v743_v52, %v715_v53 }
 0x436   :  { %v772_v54 = vpop.f32.mrf.mxu3 }
 0x437   :  { %v773_v5 = vadd.f32 %v772_v54, %v744_v55 }
 0x439   :  { %807 = vxpose.xlu2.b32.start [1/2] (short) (narrow) %v770_v51, 24 }
 0x441   :  { %808 = vxpose.xlu2.b32.end [2/2] (short) (narrow) %v773_v5, 24 }
 0x4ba   :  { %v791_v8 = vpop.trf.xlu2 }
 0x4bb   :  { %839 = vst.msk [vmem:[%s1613_s12] sm:$0xff] %vm126_vm1, %v791_v8 }
 0x4c2   :  { %v792_v11 = vpop.trf.xlu2 }
 0x4c3   :  { %840 = vst.msk [vmem:[%s1613_s12 + $0x8] sm:$0xff] %vm126_vm1, %v792_v11 }
 0x4ca   :  { %v793_v12 = vpop.trf.xlu2 }
 0x4cb   :  { %841 = vst.msk [vmem:[%s1613_s12 + $0x10] sm:$0xff] %vm126_vm1, %v793_v12 }
 0x4d2   :  { %v823_v13 = vpop.trf.xlu2 }
 0x4d3   :  { %842 = vst.msk [vmem:[%s1613_s12 + $0x18] sm:$0xff] %vm126_vm1, %v823_v13 }
 0x4da   :  { %v824_v14 = vpop.trf.xlu2 }
 0x4db   :  { %843 = vst.msk [vmem:[%s1613_s12 + $0x20] sm:$0xff] %vm126_vm1, %v824_v14 }
 0x4e2   :  { %v825_v15 = vpop.trf.xlu2 }
 0x4e3   :  { %844 = vst.msk [vmem:[%s1613_s12 + $0x28] sm:$0xff] %vm126_vm1, %v825_v15 }
 0x4e4   :  { %849 = vsyncpa [#allocation3], 1 }
 0x4e5   :  { %850 = vsyncpa [#allocation5], 1 }
 0x4e6   :  { %851 = vsyncpa [#allocation8], 1 }

</bundles_post_ra>
